<compile_context>
chip_gen: v7x
topology: tpu7x:2x2x1
jax: 0.10.0
libtpu: 0.0.40
codegen_flags: <defaults>
</compile_context>

<pallas_src>
import jax
import jax.numpy as jnp
from jax.experimental import pallas as pl
from jax.experimental.pallas import tpu as pltpu

# ----------------------------- problem sizes -----------------------------
B, CIN, H, W = 2, 4, 16, 16      # input  [B, CIN, H, W]  (NCHW, PyTorch-style)
COUT, KH, KW = 8, 3, 3           # Conv2d(CIN, COUT, kernel_size=3, padding=1)
HW = H * W
BHW = B * HW                     # batch fused into the lane axis
K = KH * KW * CIN                # im2col contraction depth = 36


# ------------------------------ Pallas kernel -----------------------------
def conv_relu_kernel(x_ref, w_ref, b_ref, m_ref, o_ref, col_ref):
    """Single invocation, whole problem resident in VMEM.

    x_ref  : (CIN, B*HW)    activations, batch fused into lanes (lane-dense)
    w_ref  : (COUT, K)      weights, tap-major / channel-minor (K = KH*KW*CIN = 36)
    b_ref  : (COUT, 1)      bias
    m_ref  : (KH*KW, B*HW)  precomputed 0/1 border masks, one row per tap
    o_ref  : (COUT, B*HW)   lane-dense output (512-lane unmasked stores)
    col_ref: (K, B*HW)      VMEM scratch: im2col activation matrix
    """
    x = x_ref[...]                                        # (CIN, B*HW)

    # Build the im2col matrix: 9 lane-rotations (XLU) + 9 mask multiplies (VPU),
    # each slab stored to a static 4-sublane slice of the scratch.
    for t in range(KH * KW):
        kh, kw = divmod(t, KW)
        delta = (kh - 1) * W + (kw - 1)                   # padding = 1
        shift = (-delta) % BHW                            # rolled[p] == x[p + delta]
        x_s = pltpu.roll(x, shift, 1) if shift != 0 else x
        col_ref[t * CIN:(t + 1) * CIN, :] = x_s * m_ref[t:t + 1, :]

    # One MXU matmul for the whole conv: (8, 36) x (36, 512) -> (8, 512).
    acc = jnp.dot(w_ref[...], col_ref[...], preferred_element_type=jnp.float32)
    o_ref[...] = jnp.maximum(acc + b_ref[...], 0.0)       # bias + ReLU, lane-dense store


def conv_relu_pallas(x_cbhw, w_flat, b_col, masks):
    """x_cbhw: [CIN, B*HW], w_flat: [COUT, K], b_col: [COUT, 1], masks: [KH*KW, B*HW]."""
    vmem = pl.BlockSpec(memory_space=pltpu.MemorySpace.VMEM)   # whole array in VMEM
    return pl.pallas_call(
        conv_relu_kernel,
        out_shape=jax.ShapeDtypeStruct((COUT, BHW), jnp.float32),
        in_specs=[vmem, vmem, vmem, vmem],
        out_specs=vmem,
        scratch_shapes=[pltpu.VMEM((K, BHW), jnp.float32)],
    )(x_cbhw, w_flat, b_col, masks)


# -------------------------- FullModelForTest port --------------------------
def inner_model(x_nchw, w_flat, b_col, masks):
    """Deterministic inner model: Conv2d(CIN, COUT, 3, padding=1) + ReLU (NCHW in/out)."""
    # Tiny one-time (B, CIN) -> (CIN, B) permute + free reshapes (done by XLA, ~8 KB).
    x_cbhw = jnp.transpose(x_nchw.reshape(B, CIN, HW), (1, 0, 2)).reshape(CIN, BHW)
    y = conv_relu_pallas(x_cbhw, w_flat, b_col, masks)         # (COUT, B*HW)
    return jnp.transpose(y.reshape(COUT, B, HW), (1, 0, 2)).reshape(B, COUT, H, W)


def full_model_for_test_forward(inputs, w_flat, b_col, masks):
    """Exact FullModelForTest.forward semantics: wrap model output in a tuple."""
    outputs = inner_model(inputs, w_flat, b_col, masks)
    if isinstance(outputs, (list, tuple)):
        ret = tuple(outputs)
    else:
        ret = (outputs,)
    return ret


# --------------------------- host-side constants ---------------------------
def build_border_masks():
    """(KH*KW, B*HW) f32 0/1 masks: 1 where the rolled fetch stays inside its own image."""
    pos = jnp.arange(BHW) % HW
    hh = pos // W
    ww = pos % W
    rows = []
    for kh in range(KH):
        for kw in range(KW):
            dh, dw = kh - 1, kw - 1
            valid = (hh + dh >= 0) & (hh + dh < H) & (ww + dw >= 0) & (ww + dw < W)
            rows.append(valid.astype(jnp.float32))
    return jnp.stack(rows)                               # (9, B*HW)


# ----------------------------------- main ----------------------------------
if __name__ == "__main__":
    key = jax.random.PRNGKey(0)
    kx, kwt, kb = jax.random.split(key, 3)

    # Deterministic inputs / parameters (synthetic; no checkpoint load).
    x = jax.random.normal(kx, (B, CIN, H, W), dtype=jnp.float32)
    # Conv2d weight in PyTorch layout [COUT, CIN, KH, KW]; flattened once host-side to
    # (COUT, KH*KW*CIN), tap-major / channel-minor, matching the im2col row order.
    w_torch = jax.random.normal(kwt, (COUT, CIN, KH, KW), dtype=jnp.float32) * 0.1
    w_flat = jnp.transpose(w_torch, (0, 2, 3, 1)).reshape(COUT, K)            # (8, 36)
    b_vec = jax.random.normal(kb, (COUT,), dtype=jnp.float32) * 0.1
    b_col = b_vec.reshape(COUT, 1)
    masks = build_border_masks()                                              # (9, 512)

    fwd = jax.jit(full_model_for_test_forward)
    ret = jax.block_until_ready(fwd(x, w_flat, b_col, masks))

    assert isinstance(ret, tuple) and len(ret) == 1
    out = ret[0]
    assert out.shape == (B, COUT, H, W), out.shape

    # Cross-check against a pure-JAX reference conv (NCHW, same as PyTorch); also
    # validates that the batch-lane fusion does not leak data across images.
    ref = jax.lax.conv_general_dilated(
        x, w_torch, window_strides=(1, 1), padding="SAME",
        dimension_numbers=("NCHW", "OIHW", "NCHW"))
    ref = jnp.maximum(ref + b_vec.reshape(1, COUT, 1, 1), 0.0)
    assert jnp.allclose(out, ref, atol=1e-4, rtol=1e-4), \
        float(jnp.max(jnp.abs(out - ref)))

    print("KERNEL_OK")
</pallas_src>

<mosaic_0001>
module attributes {stable_mosaic.version = 11 : i64} {
  func.func @conv_relu_kernel(%arg0: memref<4x512xf32, #tpu.memory_space<vmem>>, %arg1: memref<8x36xf32, #tpu.memory_space<vmem>>, %arg2: memref<8x1xf32, #tpu.memory_space<vmem>>, %arg3: memref<9x512xf32, #tpu.memory_space<vmem>>, %arg4: memref<8x512xf32, #tpu.memory_space<vmem>>, %arg5: memref<36x512xf32, #tpu.memory_space<vmem>>) attributes {dimension_semantics = [], scalar_prefetch = 0 : i64, scratch_operands = 1 : i64, tpu.core_type = #tpu.core_type<tc>} {
    %c0 = arith.constant 0 : index
    %c0_0 = arith.constant 0 : index
    %0 = vector.load %arg0[%c0, %c0_0] : memref<4x512xf32, #tpu.memory_space<vmem>>, vector<4x512xf32>
    %c17_i32 = arith.constant 17 : i32
    %1 = tpu.dynamic_rotate %0 by %c17_i32 dim 1 : vector<4x512xf32>, i32 -> vector<4x512xf32>
    %c0_1 = arith.constant 0 : index
    %c0_2 = arith.constant 0 : index
    %2 = vector.load %arg3[%c0_1, %c0_2] : memref<9x512xf32, #tpu.memory_space<vmem>>, vector<1x512xf32>
    %3 = vector.broadcast %2 : vector<1x512xf32> to vector<4x512xf32>
    %4 = arith.mulf %1, %3 : vector<4x512xf32>
    %c0_3 = arith.constant 0 : index
    %c0_4 = arith.constant 0 : index
    %5 = vector.load %arg5[%c0_3, %c0_4] : memref<36x512xf32, #tpu.memory_space<vmem>>, vector<4x512xf32>
    tpu.vector_store %arg5[%c0_3, %c0_4], %4 {strides = array<i32>} : memref<36x512xf32, #tpu.memory_space<vmem>>, vector<4x512xf32>,
    %c16_i32 = arith.constant 16 : i32
    %6 = tpu.dynamic_rotate %0 by %c16_i32 dim 1 : vector<4x512xf32>, i32 -> vector<4x512xf32>
    %c1 = arith.constant 1 : index
    %c0_5 = arith.constant 0 : index
    %7 = vector.load %arg3[%c1, %c0_5] : memref<9x512xf32, #tpu.memory_space<vmem>>, vector<1x512xf32>
    %8 = vector.broadcast %7 : vector<1x512xf32> to vector<4x512xf32>
    %9 = arith.mulf %6, %8 : vector<4x512xf32>
    %c4 = arith.constant 4 : index
    %c0_6 = arith.constant 0 : index
    %10 = vector.load %arg5[%c4, %c0_6] : memref<36x512xf32, #tpu.memory_space<vmem>>, vector<4x512xf32>
    tpu.vector_store %arg5[%c4, %c0_6], %9 {strides = array<i32>} : memref<36x512xf32, #tpu.memory_space<vmem>>, vector<4x512xf32>,
    %c15_i32 = arith.constant 15 : i32
    %11 = tpu.dynamic_rotate %0 by %c15_i32 dim 1 : vector<4x512xf32>, i32 -> vector<4x512xf32>
    %c2 = arith.constant 2 : index
    %c0_7 = arith.constant 0 : index
    %12 = vector.load %arg3[%c2, %c0_7] : memref<9x512xf32, #tpu.memory_space<vmem>>, vector<1x512xf32>
    %13 = vector.broadcast %12 : vector<1x512xf32> to vector<4x512xf32>
    %14 = arith.mulf %11, %13 : vector<4x512xf32>
    %c8 = arith.constant 8 : index
    %c0_8 = arith.constant 0 : index
    %15 = vector.load %arg5[%c8, %c0_8] : memref<36x512xf32, #tpu.memory_space<vmem>>, vector<4x512xf32>
    tpu.vector_store %arg5[%c8, %c0_8], %14 {strides = array<i32>} : memref<36x512xf32, #tpu.memory_space<vmem>>, vector<4x512xf32>,
    %c1_i32 = arith.constant 1 : i32
    %16 = tpu.dynamic_rotate %0 by %c1_i32 dim 1 : vector<4x512xf32>, i32 -> vector<4x512xf32>
    %c3 = arith.constant 3 : index
    %c0_9 = arith.constant 0 : index
    %17 = vector.load %arg3[%c3, %c0_9] : memref<9x512xf32, #tpu.memory_space<vmem>>, vector<1x512xf32>
    %18 = vector.broadcast %17 : vector<1x512xf32> to vector<4x512xf32>
    %19 = arith.mulf %16, %18 : vector<4x512xf32>
    %c12 = arith.constant 12 : index
    %c0_10 = arith.constant 0 : index
    %20 = vector.load %arg5[%c12, %c0_10] : memref<36x512xf32, #tpu.memory_space<vmem>>, vector<4x512xf32>
    tpu.vector_store %arg5[%c12, %c0_10], %19 {strides = array<i32>} : memref<36x512xf32, #tpu.memory_space<vmem>>, vector<4x512xf32>,
    %c4_11 = arith.constant 4 : index
    %c0_12 = arith.constant 0 : index
    %21 = vector.load %arg3[%c4_11, %c0_12] : memref<9x512xf32, #tpu.memory_space<vmem>>, vector<1x512xf32>
    %22 = vector.broadcast %21 : vector<1x512xf32> to vector<4x512xf32>
    %23 = arith.mulf %0, %22 : vector<4x512xf32>
    %c16 = arith.constant 16 : index
    %c0_13 = arith.constant 0 : index
    %24 = vector.load %arg5[%c16, %c0_13] : memref<36x512xf32, #tpu.memory_space<vmem>>, vector<4x512xf32>
    tpu.vector_store %arg5[%c16, %c0_13], %23 {strides = array<i32>} : memref<36x512xf32, #tpu.memory_space<vmem>>, vector<4x512xf32>,
    %c511_i32 = arith.constant 511 : i32
    %25 = tpu.dynamic_rotate %0 by %c511_i32 dim 1 : vector<4x512xf32>, i32 -> vector<4x512xf32>
    %c5 = arith.constant 5 : index
    %c0_14 = arith.constant 0 : index
    %26 = vector.load %arg3[%c5, %c0_14] : memref<9x512xf32, #tpu.memory_space<vmem>>, vector<1x512xf32>
    %27 = vector.broadcast %26 : vector<1x512xf32> to vector<4x512xf32>
    %28 = arith.mulf %25, %27 : vector<4x512xf32>
    %c20 = arith.constant 20 : index
    %c0_15 = arith.constant 0 : index
    %29 = vector.load %arg5[%c20, %c0_15] : memref<36x512xf32, #tpu.memory_space<vmem>>, vector<4x512xf32>
    tpu.vector_store %arg5[%c20, %c0_15], %28 {strides = array<i32>} : memref<36x512xf32, #tpu.memory_space<vmem>>, vector<4x512xf32>,
    %c497_i32 = arith.constant 497 : i32
    %30 = tpu.dynamic_rotate %0 by %c497_i32 dim 1 : vector<4x512xf32>, i32 -> vector<4x512xf32>
    %c6 = arith.constant 6 : index
    %c0_16 = arith.constant 0 : index
    %31 = vector.load %arg3[%c6, %c0_16] : memref<9x512xf32, #tpu.memory_space<vmem>>, vector<1x512xf32>
    %32 = vector.broadcast %31 : vector<1x512xf32> to vector<4x512xf32>
    %33 = arith.mulf %30, %32 : vector<4x512xf32>
    %c24 = arith.constant 24 : index
    %c0_17 = arith.constant 0 : index
    %34 = vector.load %arg5[%c24, %c0_17] : memref<36x512xf32, #tpu.memory_space<vmem>>, vector<4x512xf32>
    tpu.vector_store %arg5[%c24, %c0_17], %33 {strides = array<i32>} : memref<36x512xf32, #tpu.memory_space<vmem>>, vector<4x512xf32>,
    %c496_i32 = arith.constant 496 : i32
    %35 = tpu.dynamic_rotate %0 by %c496_i32 dim 1 : vector<4x512xf32>, i32 -> vector<4x512xf32>
    %c7 = arith.constant 7 : index
    %c0_18 = arith.constant 0 : index
    %36 = vector.load %arg3[%c7, %c0_18] : memref<9x512xf32, #tpu.memory_space<vmem>>, vector<1x512xf32>
    %37 = vector.broadcast %36 : vector<1x512xf32> to vector<4x512xf32>
    %38 = arith.mulf %35, %37 : vector<4x512xf32>
    %c28 = arith.constant 28 : index
    %c0_19 = arith.constant 0 : index
    %39 = vector.load %arg5[%c28, %c0_19] : memref<36x512xf32, #tpu.memory_space<vmem>>, vector<4x512xf32>
    tpu.vector_store %arg5[%c28, %c0_19], %38 {strides = array<i32>} : memref<36x512xf32, #tpu.memory_space<vmem>>, vector<4x512xf32>,
    %c495_i32 = arith.constant 495 : i32
    %40 = tpu.dynamic_rotate %0 by %c495_i32 dim 1 : vector<4x512xf32>, i32 -> vector<4x512xf32>
    %c8_20 = arith.constant 8 : index
    %c0_21 = arith.constant 0 : index
    %41 = vector.load %arg3[%c8_20, %c0_21] : memref<9x512xf32, #tpu.memory_space<vmem>>, vector<1x512xf32>
    %42 = vector.broadcast %41 : vector<1x512xf32> to vector<4x512xf32>
    %43 = arith.mulf %40, %42 : vector<4x512xf32>
    %c32 = arith.constant 32 : index
    %c0_22 = arith.constant 0 : index
    %44 = vector.load %arg5[%c32, %c0_22] : memref<36x512xf32, #tpu.memory_space<vmem>>, vector<4x512xf32>
    tpu.vector_store %arg5[%c32, %c0_22], %43 {strides = array<i32>} : memref<36x512xf32, #tpu.memory_space<vmem>>, vector<4x512xf32>,
    %c0_23 = arith.constant 0 : index
    %c0_24 = arith.constant 0 : index
    %45 = vector.load %arg1[%c0_23, %c0_24] : memref<8x36xf32, #tpu.memory_space<vmem>>, vector<8x36xf32>
    %c0_25 = arith.constant 0 : index
    %c0_26 = arith.constant 0 : index
    %46 = vector.load %arg5[%c0_25, %c0_26] : memref<36x512xf32, #tpu.memory_space<vmem>>, vector<36x512xf32>
    %cst = arith.constant dense<0.000000e+00> : vector<8x512xf32>
    %47 = tpu.matmul %45, %46, %cst {dimension_numbers = #tpu.dot_dimension_numbers<[1], [0], [0], [1], [0, 0, 1, 1], [], []>} : vector<8x36xf32>, vector<36x512xf32>, vector<8x512xf32> -> vector<8x512xf32>
    %c0_27 = arith.constant 0 : index
    %c0_28 = arith.constant 0 : index
    %48 = vector.load %arg2[%c0_27, %c0_28] : memref<8x1xf32, #tpu.memory_space<vmem>>, vector<8x1xf32>
    %49 = vector.broadcast %48 : vector<8x1xf32> to vector<8x512xf32>
    %50 = arith.addf %47, %49 : vector<8x512xf32>
    %cst_29 = arith.constant 0.000000e+00 : f32
    %51 = vector.broadcast %cst_29 : f32 to vector<8x512xf32>
    %52 = arith.maximumf %50, %51 : vector<8x512xf32>
    %c0_30 = arith.constant 0 : index
    %c0_31 = arith.constant 0 : index
    %53 = vector.load %arg4[%c0_30, %c0_31] : memref<8x512xf32, #tpu.memory_space<vmem>>, vector<8x512xf32>
    tpu.vector_store %arg4[%c0_30, %c0_31], %52 {strides = array<i32>} : memref<8x512xf32, #tpu.memory_space<vmem>>, vector<8x512xf32>,
    return
  }
}

</mosaic_0001>

<bundles_post_ra>
// kernel: full_model_for_test_forward.1
= control target key start
LH: loop header
LB: loop body
LE: loop exit
PB: predicated region body
PF: predicated region fallthrough
CT: control target
= control target key end

     0   :  { %v33_v0 = vlaneseq  ;;  %s702_s19 = smov 16   ;;  %s703_s25 = smov 1   ;;  %v710_v61 = vmov 0.0   ;;  %v711_v63 = vmov 0   ;;  %vm492_vm8 = vcmask 1043456   ;;  %s1074_s0 = inlined_call_operand.vmem [shape: f32[4,512], index: 0, kind: input, shape index: {}]   ;;  %s1075_s3 = inlined_call_operand.vmem [shape: f32[9,512], index: 3, kind: input, shape index: {}]   ;;  %s1076_s2 = inlined_call_operand.vmem [shape: f32[8,1], index: 2, kind: input, shape index: {}]   ;;  %s1077_s1 = inlined_call_operand.vmem [shape: f32[8,36], index: 1, kind: input, shape index: {}]   ;;  %s1078_s4 = inlined_call_operand.vmem [shape: f32[8,512], index: 4, kind: output, shape index: {}]  }
   0x1   :  { %v740_v1 = vld [vmem:[%s1074_s0 + $0x8] sm:$0xff]  ;;  %v745_v2 = vld [vmem:[%s1074_s0] sm:$0xff]  ;;  %s704_s28 = smov 17   ;;  %s705_s7 = smov 15   ;;  %569 = vmatprep.mubr.f32.mxu0 %v710_v61  ;;  %640 = vmatprep.mubr.f32.mxu1 %v710_v61  ;;  %vm488_vm9 = vcmask 293888  }
   0x2   :  { %74 = vrot.lane.b32.xlu1 %v740_v1, %s702_s19  ;;  %70 = vrot.lane.b32.xlu0 %v745_v2, %s702_s19  ;;  %v751_v3 = vcombine.high %v740_v1, %v740_v1  ;;  %v755_v4 = vcombine.high %v745_v2, %v745_v2  ;;  %v43_v5 = vshrl.u32 %v33_v0, 7  ;;  %v761_v6 = vld [vmem:[%s1075_s3 + $0x1] ss:$8 sm:$0xf]  ;;  %s706_s10 = smov 127   ;;  %s707_s13 = smov 112  }
   0x3   :  { %v774_v11 = vld [vmem:[%s1075_s3 + $0x3] ss:$8 sm:$0xf]  ;;  %v787_v15 = vld [vmem:[%s1075_s3] ss:$8 sm:$0xf]  ;;  %699 = vset.pattern.permute.xlu0 %v711_v63 }
   0x4   :  { %v763_v7 = vsub.s32 0, %v43_v5  ;;  %v765_v8 = vsub.s32 3, %v43_v5  ;;  %v767_v9 = vsub.s32 1, %v43_v5  ;;  %v769_v10 = vsub.s32 2, %v43_v5  ;;  %s708_s16 = smov 113   ;;  %v482_v62 = vld [vmem:[%s1076_s2] sm:$0xff] }
   0x5   :  { %v812_v25 = vld [vmem:[%s1075_s3 + $0x2] ss:$8 sm:$0xf]  ;;  %v829_v30 = vld [vmem:[%s1075_s3 + $0x5] ss:$8 sm:$0xf] }
   0x6   :  { %76 = vrot.lane.b32.xlu1 %v751_v3, %s702_s19  ;;  %72 = vrot.lane.b32.xlu0 %v755_v4, %s702_s19  ;;  %v89_v12 = vrot.slane %v761_v6, %v763_v7  ;;  %v101_v13 = vrot.slane %v761_v6, %v765_v8  ;;  %v93_v14 = vrot.slane %v761_v6, %v767_v9  ;;  %v662_v32 = vld [vmem:[%s1075_s3 + $0x4] ss:$8 sm:$0xf]  ;;  %v854_v43 = vld [vmem:[%s1075_s3 + $0x7] ss:$8 sm:$0xf] }
   0x7   :  { %v97_v16 = vrot.slane %v761_v6, %v769_v10  ;;  %v193_v17 = vrot.slane %v774_v11, %v767_v9  ;;  %v189_v18 = vrot.slane %v774_v11, %v763_v7  ;;  %v197_v19 = vrot.slane %v774_v11, %v769_v10  ;;  %v872_v51 = vld [vmem:[%s1075_s3 + $0x6] ss:$8 sm:$0xf]  ;;  %v889_v56 = vld [vmem:[%s1075_s3 + $0x20] ss:$8 sm:$0xf] }
   0x8   :  { %v201_v20 = vrot.slane %v774_v11, %v765_v8  ;;  %v49_v21 = vrot.slane %v787_v15, %v767_v9  ;;  %v45_v22 = vrot.slane %v787_v15, %v763_v7  ;;  %v53_v23 = vrot.slane %v787_v15, %v769_v10  ;;  %s709_s3 = smov 111  }
   0x9   :  { %v57_v24 = vrot.slane %v787_v15, %v765_v8  ;;  %v149_v26 = vrot.slane %v812_v25, %v767_v9  ;;  %v145_v27 = vrot.slane %v812_v25, %v763_v7  ;;  %v153_v28 = vrot.slane %v812_v25, %v769_v10 }
   0xa   :  { %172 = vrot.lane.b32.xlu1 %v755_v4, %s703_s25  ;;  %170 = vrot.lane.b32.xlu0 %v745_v2, %s703_s25  ;;  %v157_v29 = vrot.slane %v812_v25, %v765_v8  ;;  %v280_v31 = vrot.slane %v829_v30, %v763_v7  ;;  %v232_v33 = vrot.slane %v662_v32, %v763_v7  ;;  %v913_v5 = vand.u32 127, %v33_v0 }
   0xb   :  { %v236_v34 = vrot.slane %v662_v32, %v767_v9  ;;  %v240_v36 = vrot.slane %v662_v32, %v769_v10  ;;  %v244_v37 = vrot.slane %v662_v32, %v765_v8  ;;  %v292_v38 = vrot.slane %v829_v30, %v765_v8 }
   0xc   :  { %v284_v39 = vrot.slane %v829_v30, %v767_v9  ;;  %v288_v40 = vrot.slane %v829_v30, %v769_v10  ;;  %v380_v45 = vrot.slane %v854_v43, %v763_v7  ;;  %v392_v48 = vrot.slane %v854_v43, %v765_v8 }
   0xd   :  { %v245_v35 = vcombine.low %v232_v33, %v236_v34  ;;  %v246_v42 = vcombine.low %v240_v36, %v244_v37  ;;  %v384_v49 = vrot.slane %v854_v43, %v767_v9  ;;  %v388_v50 = vrot.slane %v854_v43, %v769_v10 }
   0xe   :  { %176 = vrot.lane.b32.xlu1 %v751_v3, %s703_s25  ;;  %174 = vrot.lane.b32.xlu0 %v740_v1, %s703_s25  ;;  %v336_v52 = vrot.slane %v872_v51, %v763_v7  ;;  %v348_v53 = vrot.slane %v872_v51, %v765_v8  ;;  %v340_v54 = vrot.slane %v872_v51, %v767_v9  ;;  %vm78_vm0 = vcmp.lt.s32.totalorder %v913_v5, 16 }
   0xf   :  { %v249_v41 = vmul.f32 %v245_v35, %v745_v2  ;;  %v250_v44 = vmul.f32 %v246_v42, %v740_v1  ;;  %v344_v55 = vrot.slane %v872_v51, %v769_v10  ;;  %v436_v57 = vrot.slane %v889_v56, %v763_v7 }
  0x10   :  { %v448_v58 = vrot.slane %v889_v56, %v765_v8  ;;  %v440_v59 = vrot.slane %v889_v56, %v767_v9  ;;  %v444_v60 = vrot.slane %v889_v56, %v769_v10  ;;  %vm178_vm1 = vcmp.lt.s32.totalorder %v913_v5, 1  ;;  %v461_v9 = vld [vmem:[%s1077_s1] sm:$0xff] }
  0x11   :  { %257 = vst [vmem:[#allocation2 + $0x40] sm:$0xf] %v249_v41  ;;  %v253_v46 = vcombine.high %v249_v41, %v249_v41  ;;  %v254_v47 = vcombine.high %v250_v44, %v250_v44  ;;  %259 = vst [vmem:[#allocation2 + $0x50] sm:$0xf] %v250_v44  ;;  %vm35_vm2 = vcmp.lt.s32.totalorder %v913_v5, 17  ;;  %vm134_vm3 = vcmp.lt.s32.totalorder %v913_v5, 15 }
  0x12   :  { %27 = vrot.lane.b32.xlu1 %v755_v4, %s704_s28  ;;  %25 = vrot.lane.b32.xlu0 %v745_v2, %s704_s28  ;;  %vm269_vm4 = vcmp.lt.s32.totalorder %v913_v5, 127  ;;  %vm369_vm5 = vcmp.lt.s32.totalorder %v913_v5, 112  ;;  %vm325_vm6 = vcmp.lt.s32.totalorder %v913_v5, 113  ;;  %vm425_vm7 = vcmp.lt.s32.totalorder %v913_v5, 111 }
  0x13   :  { %258 = vst [vmem:[#allocation2 + $0x48] sm:$0xf] %v253_v46  ;;  %260 = vst [vmem:[#allocation2 + $0x58] sm:$0xf] %v254_v47 }
  0x16   :  { %31 = vrot.lane.b32.xlu1 %v751_v3, %s704_s28  ;;  %29 = vrot.lane.b32.xlu0 %v740_v1, %s704_s28 }
  0x1a   :  { %128 = vrot.lane.b32.xlu1 %v755_v4, %s705_s7  ;;  %126 = vrot.lane.b32.xlu0 %v745_v2, %s705_s7 }
  0x1e   :  { %132 = vrot.lane.b32.xlu1 %v751_v3, %s705_s7  ;;  %130 = vrot.lane.b32.xlu0 %v740_v1, %s705_s7 }
  0x22   :  { %263 = vrot.lane.b32.xlu1 %v755_v4, %s706_s10  ;;  %261 = vrot.lane.b32.xlu0 %v745_v2, %s706_s10 }
  0x26   :  { %267 = vrot.lane.b32.xlu1 %v751_v3, %s706_s10  ;;  %265 = vrot.lane.b32.xlu0 %v740_v1, %s706_s10 }
  0x2a   :  { %363 = vrot.lane.b32.xlu1 %v755_v4, %s707_s13  ;;  %361 = vrot.lane.b32.xlu0 %v745_v2, %s707_s13 }
  0x2e   :  { %367 = vrot.lane.b32.xlu1 %v751_v3, %s707_s13  ;;  %365 = vrot.lane.b32.xlu0 %v740_v1, %s707_s13 }
  0x32   :  { %319 = vrot.lane.b32.xlu1 %v755_v4, %s708_s16  ;;  %317 = vrot.lane.b32.xlu0 %v745_v2, %s708_s16 }
  0x36   :  { %323 = vrot.lane.b32.xlu1 %v751_v3, %s708_s16  ;;  %321 = vrot.lane.b32.xlu0 %v740_v1, %s708_s16 }
  0x3a   :  { %419 = vrot.lane.b32.xlu1 %v755_v4, %s709_s3  ;;  %417 = vrot.lane.b32.xlu0 %v745_v2, %s709_s3 }
  0x3e   :  { %423 = vrot.lane.b32.xlu1 %v751_v3, %s709_s3  ;;  %421 = vrot.lane.b32.xlu0 %v740_v1, %s709_s3 }
  0x42   :  { %485 = vperm.xlu0 %699, %v482_v62  }
  0x74   :  { %v75_v4 = vpop.permute.xlu1 %74  ;;  %v71_v32 = vpop.permute.xlu0 %70 }
  0x78   :  { %v77_v2 = vpop.permute.xlu1 %76  ;;  %v73_v3 = vpop.permute.xlu0 %72 }
  0x79   :  { %v79_v1 = vsel %vm78_vm0, %v75_v4, %v77_v2  ;;  %v82_v33 = vsel %vm78_vm0, %v77_v2, %v71_v32  ;;  %v80_v34 = vsel %vm78_vm0, %v73_v3, %v75_v4  ;;  %v81_v35 = vsel %vm78_vm0, %v71_v32, %v73_v3 }
  0x7a   :  { %v106_v36 = vmul.f32 %v89_v12, %v82_v33  ;;  %v109_v0 = vmul.f32 %v101_v13, %v79_v1  ;;  %v107_v37 = vmul.f32 %v93_v14, %v81_v35  ;;  %v108_v41 = vmul.f32 %v97_v16, %v80_v34 }
  0x7c   :  { %v114_v42 = vrot.slane %v106_v36, 4  ;;  %v117_v44 = vrot.slane %v109_v0, 4  ;;  %v115_v46 = vrot.slane %v107_v37, 4  ;;  %v116_v47 = vrot.slane %v108_v41, 4  ;;  %v173_v61 = vpop.permute.xlu1 %172  ;;  %v171_v62 = vpop.permute.xlu0 %170 }
  0x7d   :  { %v181_v12 = vsel %vm178_vm1, %v171_v62, %v173_v61 }
  0x7e   :  { %122 = vst [vmem:[#allocation2] sm:$0xf0] %v114_v42  ;;  %125 = vst [vmem:[#allocation2 + $0x18] sm:$0xf0] %v117_v44  ;;  %v207_v13 = vmul.f32 %v193_v17, %v181_v12 }
  0x7f   :  { %123 = vst [vmem:[#allocation2 + $0x8] sm:$0xf0] %v115_v46  ;;  %124 = vst [vmem:[#allocation2 + $0x10] sm:$0xf0] %v116_v47 }
  0x80   :  { %v215_v14 = vrot.slane %v207_v13, 4  ;;  %v177_v6 = vpop.permute.xlu1 %176  ;;  %v175_v16 = vpop.permute.xlu0 %174 }
  0x81   :  { %v182_v63 = vsel %vm178_vm1, %v177_v6, %v171_v62  ;;  %v179_v4 = vsel %vm178_vm1, %v175_v16, %v177_v6  ;;  %v180_v32 = vsel %vm178_vm1, %v173_v61, %v175_v16 }
  0x82   :  { %223 = vst [vmem:[#allocation2 + $0x28] sm:$0xf0] %v215_v14  ;;  %v206_v2 = vmul.f32 %v189_v18, %v182_v63  ;;  %v208_v17 = vmul.f32 %v197_v19, %v180_v32  ;;  %v209_v3 = vmul.f32 %v201_v20, %v179_v4 }
  0x84   :  { %v214_v1 = vrot.slane %v206_v2, 4  ;;  %v216_v33 = vrot.slane %v208_v17, 4  ;;  %v217_v34 = vrot.slane %v209_v3, 4  ;;  %v28_v35 = vpop.permute.xlu1 %27  ;;  %v26_v36 = vpop.permute.xlu0 %25 }
  0x85   :  { %v38_v0 = vsel %vm35_vm2, %v26_v36, %v28_v35 }
  0x86   :  { %222 = vst [vmem:[#allocation2 + $0x20] sm:$0xf0] %v214_v1  ;;  %224 = vst [vmem:[#allocation2 + $0x30] sm:$0xf0] %v216_v33  ;;  %v63_v18 = vmul.f32 %v49_v21, %v38_v0 }
  0x87   :  { %225 = vst [vmem:[#allocation2 + $0x38] sm:$0xf0] %v217_v34 }
  0x88   :  { %67 = vst [vmem:[#allocation2 + $0x8] sm:$0xf] %v63_v18  ;;  %v32_v11 = vpop.permute.xlu1 %31  ;;  %v30_v19 = vpop.permute.xlu0 %29 }
  0x89   :  { %v39_v20 = vsel %vm35_vm2, %v32_v11, %v26_v36  ;;  %v36_v37 = vsel %vm35_vm2, %v30_v19, %v32_v11  ;;  %v37_v41 = vsel %vm35_vm2, %v28_v35, %v30_v19 }
  0x8a   :  { %v62_v42 = vmul.f32 %v45_v22, %v39_v20  ;;  %v64_v21 = vmul.f32 %v53_v23, %v37_v41  ;;  %v65_v44 = vmul.f32 %v57_v24, %v36_v37 }
  0x8c   :  { %66 = vst [vmem:[#allocation2] sm:$0xf] %v62_v42  ;;  %68 = vst [vmem:[#allocation2 + $0x10] sm:$0xf] %v64_v21  ;;  %v129_v46 = vpop.permute.xlu1 %128  ;;  %v127_v47 = vpop.permute.xlu0 %126 }
  0x8d   :  { %69 = vst [vmem:[#allocation2 + $0x18] sm:$0xf] %v65_v44  ;;  %v137_v61 = vsel %vm134_vm3, %v127_v47, %v129_v46 }
  0x8e   :  { %v163_v22 = vmul.f32 %v149_v26, %v137_v61 }
  0x8f   :  { %v463_v4 = vld [vmem:[#allocation2 + $0x8] sm:$0xff] }
  0x90   :  { %167 = vst [vmem:[#allocation2 + $0x28] sm:$0xf] %v163_v22  ;;  %v133_v62 = vpop.permute.xlu1 %132  ;;  %v131_v12 = vpop.permute.xlu0 %130 }
  0x91   :  { %v138_v23 = vsel %vm134_vm3, %v133_v62, %v127_v47  ;;  %v135_v13 = vsel %vm134_vm3, %v131_v12, %v133_v62  ;;  %v136_v14 = vsel %vm134_vm3, %v129_v46, %v131_v12 }
  0x92   :  { %v162_v15 = vmul.f32 %v145_v27, %v138_v23  ;;  %v164_v24 = vmul.f32 %v153_v28, %v136_v14  ;;  %v165_v6 = vmul.f32 %v157_v29, %v135_v13 }
  0x93   :  { %v462_v35 = vld [vmem:[#allocation2] sm:$0xff]  ;;  %v464_v21 = vld [vmem:[#allocation2 + $0x10] sm:$0xff] }
  0x94   :  { %166 = vst [vmem:[#allocation2 + $0x20] sm:$0xf] %v162_v15  ;;  %168 = vst [vmem:[#allocation2 + $0x30] sm:$0xf] %v164_v24  ;;  %v264_v26 = vpop.permute.xlu1 %263  ;;  %v262_v16 = vpop.permute.xlu0 %261  ;;  %v465_v42 = vld [vmem:[#allocation2 + $0x18] sm:$0xff] }
  0x95   :  { %169 = vst [vmem:[#allocation2 + $0x38] sm:$0xf] %v165_v6  ;;  %v272_v63 = vsel %vm269_vm4, %v262_v16, %v264_v26 }
  0x96   :  { %v297_v27 = vmul.f32 %v280_v31, %v272_v63 }
  0x97   :  { %v467_v28 = vld [vmem:[#allocation2 + $0x28] sm:$0xff] }
  0x98   :  { %v305_v32 = vrot.slane %v297_v27, 4  ;;  %v268_v2 = vpop.permute.xlu1 %267  ;;  %v266_v25 = vpop.permute.xlu0 %265  ;;  %v673_v29 = vpack.c.bf16 %v467_v28, %v463_v4 }
  0x99   :  { %v273_v17 = vsel %vm269_vm4, %v268_v2, %v262_v16  ;;  %v270_v3 = vsel %vm269_vm4, %v266_v25, %v268_v2  ;;  %v271_v1 = vsel %vm269_vm4, %v264_v26, %v266_v25 }
  0x9a   :  { %313 = vst [vmem:[#allocation2 + $0x40] sm:$0xf0] %v305_v32  ;;  %v300_v31 = vmul.f32 %v292_v38, %v273_v17  ;;  %v298_v33 = vmul.f32 %v284_v39, %v271_v1  ;;  %v299_v34 = vmul.f32 %v288_v40, %v270_v3  ;;  %674 = vmatprep.subr.bf16.mxu0 %v673_v29 }
  0x9b   :  { %v466_v36 = vld [vmem:[#allocation2 + $0x20] sm:$0xff]  ;;  %v468_v18 = vld [vmem:[#allocation2 + $0x30] sm:$0xff] }
  0x9c   :  { %v469_v0 = vld [vmem:[#allocation2 + $0x38] sm:$0xff]  ;;  %v308_v11 = vrot.slane %v300_v31, 4  ;;  %v306_v19 = vrot.slane %v298_v33, 4  ;;  %v307_v20 = vrot.slane %v299_v34, 4  ;;  %v364_v37 = vpop.permute.xlu1 %363  ;;  %v362_v38 = vpop.permute.xlu0 %361  ;;  %v675_v41 = vpack.c.bf16 %v466_v36, %v462_v35 }
  0x9d   :  { %v372_v39 = vsel %vm369_vm5, %v362_v38, %v364_v37  ;;  %v681_v30 = vpack.c.bf16 %v469_v0, %v465_v42  ;;  %v683_v40 = vpack.c.bf16 %v468_v18, %v464_v21 }
  0x9e   :  { %316 = vst [vmem:[#allocation2 + $0x58] sm:$0xf0] %v308_v11  ;;  %314 = vst [vmem:[#allocation2 + $0x48] sm:$0xf0] %v306_v19  ;;  %v397_v44 = vmul.f32 %v380_v45, %v372_v39  ;;  %676 = vmatpush1.bf16.msra.mxu0 %v675_v41 }
  0x9f   :  { %315 = vst [vmem:[#allocation2 + $0x50] sm:$0xf0] %v307_v20  ;;  %682 = vmatprep.subr.bf16.mxu1 %v681_v30 }
  0xa0   :  { %v405_v46 = vrot.slane %v397_v44, 4  ;;  %684 = vmatpush1.bf16.msra.mxu1 %v683_v40  ;;  %v368_v47 = vpop.permute.xlu1 %367  ;;  %v366_v61 = vpop.permute.xlu0 %365 }
  0xa1   :  { %v373_v22 = vsel %vm369_vm5, %v368_v47, %v362_v38  ;;  %v370_v62 = vsel %vm369_vm5, %v366_v61, %v368_v47  ;;  %v371_v12 = vsel %vm369_vm5, %v364_v37, %v366_v61 }
  0xa2   :  { %413 = vst [vmem:[#allocation2 + $0x60] sm:$0xf0] %v405_v46  ;;  %v400_v45 = vmul.f32 %v392_v48, %v373_v22  ;;  %v398_v23 = vmul.f32 %v384_v49, %v371_v12  ;;  %v399_v13 = vmul.f32 %v388_v50, %v370_v62 }
  0xa4   :  { %v408_v14 = vrot.slane %v400_v45, 4  ;;  %v406_v15 = vrot.slane %v398_v23, 4  ;;  %v407_v24 = vrot.slane %v399_v13, 4  ;;  %v320_v6 = vpop.permute.xlu1 %319  ;;  %v318_v26 = vpop.permute.xlu0 %317 }
  0xa5   :  { %v328_v16 = vsel %vm325_vm6, %v318_v26, %v320_v6  ;;  %v471_v51 = vld [vmem:[#allocation2 + $0x48] sm:$0xff] }
  0xa6   :  { %416 = vst [vmem:[#allocation2 + $0x78] sm:$0xf0] %v408_v14  ;;  %414 = vst [vmem:[#allocation2 + $0x68] sm:$0xf0] %v406_v15  ;;  %v353_v48 = vmul.f32 %v336_v52, %v328_v16  ;;  %v472_v33 = vld [vmem:[#allocation2 + $0x50] sm:$0xff] }
  0xa7   :  { %415 = vst [vmem:[#allocation2 + $0x70] sm:$0xf0] %v407_v24 }
  0xa8   :  { %357 = vst [vmem:[#allocation2 + $0x60] sm:$0xf] %v353_v48  ;;  %v324_v43 = vpop.permute.xlu1 %323  ;;  %v322_v49 = vpop.permute.xlu0 %321 }
  0xa9   :  { %v329_v50 = vsel %vm325_vm6, %v324_v43, %v318_v26  ;;  %v326_v63 = vsel %vm325_vm6, %v322_v49, %v324_v43  ;;  %v327_v27 = vsel %vm325_vm6, %v320_v6, %v322_v49 }
  0xaa   :  { %v356_v4 = vmul.f32 %v348_v53, %v329_v50  ;;  %v354_v52 = vmul.f32 %v340_v54, %v327_v27  ;;  %v355_v28 = vmul.f32 %v344_v55, %v326_v63 }
  0xac   :  { %360 = vst [vmem:[#allocation2 + $0x78] sm:$0xf] %v356_v4  ;;  %358 = vst [vmem:[#allocation2 + $0x68] sm:$0xf] %v354_v52  ;;  %v420_v32 = vpop.permute.xlu1 %419  ;;  %v418_v2 = vpop.permute.xlu0 %417 }
  0xad   :  { %359 = vst [vmem:[#allocation2 + $0x70] sm:$0xf] %v355_v28  ;;  %v428_v25 = vsel %vm425_vm7, %v418_v2, %v420_v32 }
  0xae   :  { %v453_v53 = vmul.f32 %v436_v57, %v428_v25  ;;  %v473_v57 = vld [vmem:[#allocation2 + $0x58] sm:$0xff] }
  0xaf   :  { %v474_v31 = vld [vmem:[#allocation2 + $0x60] sm:$0xff] }
  0xb0   :  { %457 = vst [vmem:[#allocation2 + $0x80] sm:$0xf] %v453_v53  ;;  %v424_v29 = vpop.permute.xlu1 %423  ;;  %v422_v17 = vpop.permute.xlu0 %421 }
  0xb1   :  { %v429_v54 = vsel %vm425_vm7, %v424_v29, %v418_v2  ;;  %v426_v3 = vsel %vm425_vm7, %v422_v17, %v424_v29  ;;  %v427_v1 = vsel %vm425_vm7, %v420_v32, %v422_v17 }
  0xb2   :  { %v456_v55 = vmul.f32 %v448_v58, %v429_v54  ;;  %v454_v5 = vmul.f32 %v440_v59, %v427_v1  ;;  %v455_v7 = vmul.f32 %v444_v60, %v426_v3  ;;  %v470_v58 = vld [vmem:[#allocation2 + $0x40] sm:$0xff] }
  0xb3   :  { %v475_v34 = vld [vmem:[#allocation2 + $0x68] sm:$0xff]  ;;  %v477_v35 = vld [vmem:[#allocation2 + $0x78] sm:$0xff]  ;;  %v679_v11 = vpack.c.bf16 %v474_v31, %v470_v58 }
  0xb4   :  { %v476_v36 = vld [vmem:[#allocation2 + $0x70] sm:$0xff]  ;;  %460 = vst [vmem:[#allocation2 + $0x98] sm:$0xf] %v456_v55  ;;  %458 = vst [vmem:[#allocation2 + $0x88] sm:$0xf] %v454_v5  ;;  %v677_v0 = vpack.c.bf16 %v475_v34, %v471_v51  ;;  %v685_v8 = vpack.c.bf16 %v477_v35, %v473_v57 }
  0xb5   :  { %459 = vst [vmem:[#allocation2 + $0x90] sm:$0xf] %v455_v7  ;;  %v687_v18 = vpack.c.bf16 %v476_v36, %v472_v33 }
  0xb6   :  { %678 = vmatprep.subr.bf16.mxu0 %v677_v0  ;;  %686 = vmatprep.subr.bf16.mxu1 %v685_v8 }
  0xb7   :  { %680 = vmatpush1.bf16.msra.mxu0 %v679_v11  ;;  %688 = vmatpush1.bf16.msra.mxu1 %v687_v18  ;;  %v478_v60 = vld [vmem:[#allocation2 + $0x80] sm:$0xf] }
  0xbb   :  { %v479_v10 = vld [vmem:[#allocation2 + $0x88] sm:$0xf]  ;;  %v481_v56 = vld [vmem:[#allocation2 + $0x98] sm:$0xf] }
  0xbc   :  { %v480_v59 = vld [vmem:[#allocation2 + $0x90] sm:$0xf]  ;;  %667 = vmatprep.subr.msk.mxu0 %vm492_vm8, %v479_v10  ;;  %670 = vmatprep.subr.msk.mxu1 %vm492_vm8, %v481_v56 }
  0xbd   :  { %668 = vmatpush1.msk.msra.mxu0 %vm492_vm8, %v478_v60  ;;  %671 = vmatpush1.msk.msra.mxu1 %vm492_vm8, %v480_v59 }
  0xbe   :  { %669 = vmatmul.mubr.msk.f32.vlgmr.msra.gmra.mrb[0].mxu0 %vm488_vm9, %v461_v9  ;;  %672 = vmatmul.mubr.msk.f32.vlgmr.msra.gmra.mrb[0].mxu1 %vm488_vm9, %v461_v9 }
  0xc1   :  { %v486_v19 = vpop.permute.xlu0 %485 }
 0x191   :  { %v571_v20 = vpop.f32.mrb[0].mxu0  ;;  %v642_v37 = vpop.f32.mrb[0].mxu1 }
 0x192   :  { %v572_v38 = vadd.f32 %v571_v20, %v486_v19  ;;  %v643_v41 = vadd.f32 %v642_v37, %v486_v19  ;;  %v573_v42 = vpop.f32.mrb[1].mxu0  ;;  %v644_v21 = vpop.f32.mrb[1].mxu1 }
 0x193   :  { %v574_v39 = vadd.f32 %v573_v42, %v486_v19  ;;  %v645_v30 = vadd.f32 %v644_v21, %v486_v19 }
 0x194   :  { %v647_v40 = vmax.f32 %v572_v38, 0.0  ;;  %v649_v44 = vmax.f32 %v643_v41, 0.0 }
 0x195   :  { %v648_v46 = vmax.f32 %v574_v39, 0.0  ;;  %v650_v47 = vmax.f32 %v645_v30, 0.0 }
 0x196   :  { %651 = vst [vmem:[%s1078_s4] sm:$0xff] %v647_v40  ;;  %653 = vst [vmem:[%s1078_s4 + $0x10] sm:$0xff] %v649_v44 }
 0x197   :  { %652 = vst [vmem:[%s1078_s4 + $0x8] sm:$0xff] %v648_v46  ;;  %654 = vst [vmem:[%s1078_s4 + $0x18] sm:$0xff] %v650_v47 }

</bundles_post_ra>
